<compile_context>
chip_gen: v5e
topology: v5e:2x2
jax: 0.10.0
libtpu: 0.0.40
codegen_flags: <defaults>
</compile_context>

<pallas_src>
import functools
import math

import jax
import jax.numpy as jnp
from jax.experimental import pallas as pl
from jax.experimental.pallas import tpu as pltpu

LN_EPS = 1e-5

_CP = pltpu.CompilerParams(
    dimension_semantics=("parallel",),
    vmem_limit_bytes=48 * 1024 * 1024,
)


def _round_up(n, m):
    return ((n + m - 1) // m) * m


def _layer_norm_rows(x, g, b, eps):
    mu = jnp.mean(x, axis=-1, keepdims=True)
    var = jnp.mean(jnp.square(x - mu), axis=-1, keepdims=True)
    return (x - mu) * jax.lax.rsqrt(var + eps) * g + b


# ----------------------------- kernels -----------------------------

def _qkv_proj_kernel(x_ref, wq_ref, bq_ref, wk_ref, bk_ref, wv_ref, bv_ref,
                     q_ref, k_ref, v_ref):
    x = x_ref[...].astype(jnp.float32)
    q_ref[...] = (jnp.dot(x, wq_ref[...], preferred_element_type=jnp.float32)
                  + bq_ref[...]).astype(q_ref.dtype)
    k_ref[...] = (jnp.dot(x, wk_ref[...], preferred_element_type=jnp.float32)
                  + bk_ref[...]).astype(k_ref.dtype)
    v_ref[...] = (jnp.dot(x, wv_ref[...], preferred_element_type=jnp.float32)
                  + bv_ref[...]).astype(v_ref.dtype)


def _attn_core_kernel(q_ref, k_ref, v_ref, bias_ref, o_ref, *,
                      num_heads, head_dim, scale):
    # Blocks are (1, T, D) per batch element; bias is (1, T, T) additive.
    q = q_ref[0].astype(jnp.float32)
    k = k_ref[0].astype(jnp.float32)
    v = v_ref[0].astype(jnp.float32)
    bias = bias_ref[0]

    head_outs = []
    for h in range(num_heads):          # static, unrolled
        lo, hi = h * head_dim, (h + 1) * head_dim
        qh = q[:, lo:hi] * scale
        kh = k[:, lo:hi]
        vh = v[:, lo:hi]
        # scores = qh @ kh.T  (contract head_dim of both; avoids explicit transpose)
        s = jax.lax.dot_general(qh, kh, (((1,), (1,)), ((), ())),
                                preferred_element_type=jnp.float32) + bias
        s = s - jnp.max(s, axis=-1, keepdims=True)
        p = jnp.exp(s)
        p = p / jnp.sum(p, axis=-1, keepdims=True)
        head_outs.append(jnp.dot(p, vh, preferred_element_type=jnp.float32))

    out = jnp.concatenate(head_outs, axis=-1)        # (T, D) lane-dense
    o_ref[0] = out.astype(o_ref.dtype)


def _outproj_res_ln_kernel(a_ref, res_ref, wo_ref, bo_ref, g_ref, beta_ref, o_ref,
                           *, eps):
    a = a_ref[...].astype(jnp.float32)
    y = jnp.dot(a, wo_ref[...], preferred_element_type=jnp.float32) + bo_ref[...]
    r = res_ref[...].astype(jnp.float32) + y
    o_ref[...] = _layer_norm_rows(r, g_ref[...], beta_ref[...], eps).astype(o_ref.dtype)


def _ffn_res_ln_kernel(x_ref, w1_ref, b1_ref, w2_ref, b2_ref, g_ref, beta_ref, o_ref,
                       *, eps):
    x = x_ref[...].astype(jnp.float32)
    h = jnp.maximum(
        jnp.dot(x, w1_ref[...], preferred_element_type=jnp.float32) + b1_ref[...], 0.0)
    y = jnp.dot(h, w2_ref[...], preferred_element_type=jnp.float32) + b2_ref[...]
    r = x + y
    o_ref[...] = _layer_norm_rows(r, g_ref[...], beta_ref[...], eps).astype(o_ref.dtype)


# ----------------------------- wrappers -----------------------------

def encoder_sublayers(x, key_padding_mask, attn_mask, p, *, num_heads, row_tile=512):
    """One post-norm transformer encoder block (self-attn + FFN), eval mode.

    x: [T, B, D]; key_padding_mask: [B, T] (1 = padded key) or None;
    attn_mask: additive float [T, T] or None.  Returns [T, B, D].
    """
    T, B, D = x.shape
    H = num_heads
    Dh = D // H
    scale = float(Dh) ** -0.5
    N = T * B
    dtype = x.dtype
    F = p["w1"].shape[0]

    # (T,B,D) -> (B,T,D) -> token rows [N, D]; feature axis maps to TPU lanes.
    rows = jnp.transpose(x, (1, 0, 2)).reshape(N, D)

    rt = min(row_tile, _round_up(N, 8))
    Np = _round_up(N, rt)
    if Np != N:
        rows_p = jnp.concatenate([rows, jnp.zeros((Np - N, D), dtype)], axis=0)
    else:
        rows_p = rows
    n_row_blocks = Np // rt

    row_spec = lambda d: pl.BlockSpec((rt, d), lambda i: (i, 0))
    wmat = lambda r, c: pl.BlockSpec((r, c), lambda i: (0, 0))

    # --- 1. fused Q/K/V projection (rows tiled) ---
    q_rows, k_rows, v_rows = pl.pallas_call(
        _qkv_proj_kernel,
        out_shape=(jax.ShapeDtypeStruct((Np, D), dtype),) * 3,
        grid_spec=pltpu.PrefetchScalarGridSpec(
            num_scalar_prefetch=0,
            grid=(n_row_blocks,),
            in_specs=[row_spec(D),
                      wmat(D, D), wmat(1, D),
                      wmat(D, D), wmat(1, D),
                      wmat(D, D), wmat(1, D)],
            out_specs=[row_spec(D), row_spec(D), row_spec(D)],
        ),
        compiler_params=_CP,
    )(rows_p,
      p["wq"].T, p["bq"].reshape(1, D),
      p["wk"].T, p["bk"].reshape(1, D),
      p["wv"].T, p["bv"].reshape(1, D))

    # --- 2. attention core (grid over batch); masks folded into one additive bias ---
    qb = q_rows[:N].reshape(B, T, D)
    kb = k_rows[:N].reshape(B, T, D)
    vb = v_rows[:N].reshape(B, T, D)

    bias = jnp.zeros((B, T, T), jnp.float32)
    if attn_mask is not None:
        bias = bias + attn_mask.astype(jnp.float32)[None, :, :]
    if key_padding_mask is not None:
        bias = bias + jnp.where(key_padding_mask.astype(bool), -1e9, 0.0
                                ).astype(jnp.float32)[:, None, :]

    attn = pl.pallas_call(
        functools.partial(_attn_core_kernel, num_heads=H, head_dim=Dh, scale=scale),
        out_shape=jax.ShapeDtypeStruct((B, T, D), dtype),
        grid_spec=pltpu.PrefetchScalarGridSpec(
            num_scalar_prefetch=0,
            grid=(B,),
            in_specs=[pl.BlockSpec((1, T, D), lambda b: (b, 0, 0)),
                      pl.BlockSpec((1, T, D), lambda b: (b, 0, 0)),
                      pl.BlockSpec((1, T, D), lambda b: (b, 0, 0)),
                      pl.BlockSpec((1, T, T), lambda b: (b, 0, 0))],
            out_specs=pl.BlockSpec((1, T, D), lambda b: (b, 0, 0)),
        ),
        compiler_params=_CP,
    )(qb, kb, vb, bias)

    attn_rows = attn.reshape(N, D)
    if Np != N:
        attn_rows = jnp.concatenate(
            [attn_rows, jnp.zeros((Np - N, D), dtype)], axis=0)

    # --- 3. out-proj + residual + LayerNorm (self_attn_layer_norm), fused ---
    x1_rows = pl.pallas_call(
        functools.partial(_outproj_res_ln_kernel, eps=LN_EPS),
        out_shape=jax.ShapeDtypeStruct((Np, D), dtype),
        grid_spec=pltpu.PrefetchScalarGridSpec(
            num_scalar_prefetch=0,
            grid=(n_row_blocks,),
            in_specs=[row_spec(D), row_spec(D),
                      wmat(D, D), wmat(1, D), wmat(1, D), wmat(1, D)],
            out_specs=row_spec(D),
        ),
        compiler_params=_CP,
    )(attn_rows, rows_p,
      p["wo"].T, p["bo"].reshape(1, D),
      p["ln1_g"].reshape(1, D), p["ln1_b"].reshape(1, D))

    # --- 4. FFN + residual + LayerNorm (final_layer_norm), fused ---
    x2_rows = pl.pallas_call(
        functools.partial(_ffn_res_ln_kernel, eps=LN_EPS),
        out_shape=jax.ShapeDtypeStruct((Np, D), dtype),
        grid_spec=pltpu.PrefetchScalarGridSpec(
            num_scalar_prefetch=0,
            grid=(n_row_blocks,),
            in_specs=[row_spec(D),
                      wmat(D, F), wmat(1, F),
                      wmat(F, D), wmat(1, D),
                      wmat(1, D), wmat(1, D)],
            out_specs=row_spec(D),
        ),
        compiler_params=_CP,
    )(x1_rows,
      p["w1"].T, p["b1"].reshape(1, F),
      p["w2"].T, p["b2"].reshape(1, D),
      p["ln2_g"].reshape(1, D), p["ln2_b"].reshape(1, D))

    return jnp.transpose(x2_rows[:N].reshape(B, T, D), (1, 0, 2))


def transformer_encoder_layer(x, src_img_features, noisy_src_img_features,
                              encoder_padding_mask, encoder_padding_mask_image,
                              mask_matrix_tmp, params, *, num_heads, attn_mask=None):
    """Mirrors TransformerEncoderLayer.forward (eval mode). Returns (x, img, noisy_img)."""
    del encoder_padding_mask_image  # the image self-attn is called with key_padding_mask=None
    del mask_matrix_tmp  # TODO(synk): MultiheadAttention_Image mask_matrix_tmp semantics undefined in spec
    x_out = encoder_sublayers(x, encoder_padding_mask, attn_mask,
                              params["text"], num_heads=num_heads)
    img_out = encoder_sublayers(src_img_features, None, None,
                                params["image"], num_heads=num_heads)
    noisy_out = encoder_sublayers(noisy_src_img_features, None, None,
                                  params["image"], num_heads=num_heads)
    return x_out, img_out, noisy_out


# ----------------------------- reference & params -----------------------------

def _layer_norm_ref(x, g, b, eps=LN_EPS):
    mu = jnp.mean(x, axis=-1, keepdims=True)
    var = jnp.mean(jnp.square(x - mu), axis=-1, keepdims=True)
    return (x - mu) * jax.lax.rsqrt(var + eps) * g + b


def encoder_sublayers_ref(x, key_padding_mask, attn_mask, p, num_heads):
    """Pure-JAX reference mirroring the PyTorch forward (eval, post-norm)."""
    T, B, D = x.shape
    H = num_heads
    Dh = D // H
    scale = float(Dh) ** -0.5
    residual = x
    q = x @ p["wq"].T + p["bq"]
    k = x @ p["wk"].T + p["bk"]
    v = x @ p["wv"].T + p["bv"]

    def split(t):  # (T,B,D) -> (B,H,T,Dh), heads = contiguous D slices (fairseq layout)
        return t.transpose(1, 0, 2).reshape(B, T, H, Dh).transpose(0, 2, 1, 3)

    qh, kh, vh = split(q), split(k), split(v)
    s = jnp.einsum("bhtd,bhsd->bhts", qh * scale, kh)
    if attn_mask is not None:
        s = s + attn_mask[None, None]
    if key_padding_mask is not None:
        s = s + jnp.where(key_padding_mask.astype(bool), -1e9, 0.0)[:, None, None, :]
    w = jax.nn.softmax(s, axis=-1)
    o = jnp.einsum("bhts,bhsd->bhtd", w, vh)
    o = o.transpose(0, 2, 1, 3).reshape(B, T, D).transpose(1, 0, 2)
    o = o @ p["wo"].T + p["bo"]
    x1 = _layer_norm_ref(residual + o, p["ln1_g"], p["ln1_b"])
    h = jax.nn.relu(x1 @ p["w1"].T + p["b1"])
    y = h @ p["w2"].T + p["b2"]
    return _layer_norm_ref(x1 + y, p["ln2_g"], p["ln2_b"])


def _xavier(key, out_dim, in_dim):
    lim = math.sqrt(6.0 / (in_dim + out_dim))
    return jax.random.uniform(key, (out_dim, in_dim), jnp.float32, -lim, lim)


def init_branch_params(key, D, F):
    ks = jax.random.split(key, 16)
    n = lambda k, shape: 0.02 * jax.random.normal(k, shape, jnp.float32)
    p = {}
    p["wq"], p["bq"] = _xavier(ks[0], D, D), n(ks[1], (D,))
    p["wk"], p["bk"] = _xavier(ks[2], D, D), n(ks[3], (D,))
    p["wv"], p["bv"] = _xavier(ks[4], D, D), n(ks[5], (D,))
    p["wo"], p["bo"] = _xavier(ks[6], D, D), n(ks[7], (D,))
    p["ln1_g"], p["ln1_b"] = 1.0 + n(ks[8], (D,)), n(ks[9], (D,))
    p["w1"], p["b1"] = _xavier(ks[10], F, D), n(ks[11], (F,))
    p["w2"], p["b2"] = _xavier(ks[12], D, F), n(ks[13], (D,))
    p["ln2_g"], p["ln2_b"] = 1.0 + n(ks[14], (D,)), n(ks[15], (D,))
    return p


if __name__ == "__main__":
    key = jax.random.PRNGKey(0)
    D = 128      # encoder_embed_dim (gating_dim in the spec is 128)
    H = 4        # encoder_attention_heads
    F = 256      # encoder_ffn_embed_dim
    T, B = 8, 2  # seq_len, batch

    keys = jax.random.split(key, 6)
    x = jax.random.normal(keys[0], (T, B, D), jnp.float32)
    src_img = jax.random.normal(keys[1], (T, B, D), jnp.float32)
    noisy_img = jax.random.normal(keys[2], (T, B, D), jnp.float32)
    enc_pad_mask = jnp.zeros((B, T), jnp.int32).at[1, T - 2:].set(1)  # pad 2 keys of batch 1
    enc_pad_mask_img = jnp.zeros((B, T), jnp.int32)
    mask_matrix_tmp = jnp.zeros((T, T), jnp.float32)  # accepted but unused (see TODO)

    params = {"text": init_branch_params(keys[3], D, F),
              "image": init_branch_params(keys[4], D, F)}

    outs = transformer_encoder_layer(x, src_img, noisy_img, enc_pad_mask,
                                     enc_pad_mask_img, mask_matrix_tmp, params,
                                     num_heads=H)
    outs = jax.block_until_ready(outs)
    x_out, img_out, noisy_out = outs

    x_ref = encoder_sublayers_ref(x, enc_pad_mask, None, params["text"], H)
    img_ref = encoder_sublayers_ref(src_img, None, None, params["image"], H)
    noisy_ref = encoder_sublayers_ref(noisy_img, None, None, params["image"], H)

    assert x_out.shape == (T, B, D)
    for got, ref in ((x_out, x_ref), (img_out, img_ref), (noisy_out, noisy_ref)):
        err = float(jnp.max(jnp.abs(got - ref)))
        assert jnp.allclose(got, ref, atol=1e-3, rtol=1e-3), f"mismatch vs reference: {err}"

    print("KERNEL_OK")
</pallas_src>

<mosaic_0001>
module attributes {stable_mosaic.version = 11 : i64} {
  func.func @_qkv_proj_kernel(%arg0: i32, %arg1: memref<16x128xf32, #tpu.memory_space<vmem>>, %arg2: memref<128x128xf32, #tpu.memory_space<vmem>>, %arg3: memref<1x128xf32, #tpu.memory_space<vmem>>, %arg4: memref<128x128xf32, #tpu.memory_space<vmem>>, %arg5: memref<1x128xf32, #tpu.memory_space<vmem>>, %arg6: memref<128x128xf32, #tpu.memory_space<vmem>>, %arg7: memref<1x128xf32, #tpu.memory_space<vmem>>, %arg8: memref<16x128xf32, #tpu.memory_space<vmem>>, %arg9: memref<16x128xf32, #tpu.memory_space<vmem>>, %arg10: memref<16x128xf32, #tpu.memory_space<vmem>>) attributes {dimension_semantics = [#tpu.dimension_semantics<parallel>], iteration_bounds = array<i64: 1>, scalar_prefetch = 0 : i64, scratch_operands = 0 : i64, tpu.core_type = #tpu.core_type<tc>, window_params = [{transform_indices = @transform_0, window_bounds = array<i64: 16, 128>}, {pipeline_mode = #tpu.pipeline_mode<synchronous>, transform_indices = @transform_1, window_bounds = array<i64: 128, 128>}, {pipeline_mode = #tpu.pipeline_mode<synchronous>, transform_indices = @transform_2, window_bounds = array<i64: 1, 128>}, {pipeline_mode = #tpu.pipeline_mode<synchronous>, transform_indices = @transform_3, window_bounds = array<i64: 128, 128>}, {pipeline_mode = #tpu.pipeline_mode<synchronous>, transform_indices = @transform_4, window_bounds = array<i64: 1, 128>}, {pipeline_mode = #tpu.pipeline_mode<synchronous>, transform_indices = @transform_5, window_bounds = array<i64: 128, 128>}, {pipeline_mode = #tpu.pipeline_mode<synchronous>, transform_indices = @transform_6, window_bounds = array<i64: 1, 128>}, {transform_indices = @transform_7, window_bounds = array<i64: 16, 128>}, {transform_indices = @transform_8, window_bounds = array<i64: 16, 128>}, {transform_indices = @transform_9, window_bounds = array<i64: 16, 128>}]} {
    %c0 = arith.constant 0 : index
    %c0_0 = arith.constant 0 : index
    %0 = vector.load %arg1[%c0, %c0_0] : memref<16x128xf32, #tpu.memory_space<vmem>>, vector<16x128xf32>
    %c0_1 = arith.constant 0 : index
    %c0_2 = arith.constant 0 : index
    %1 = vector.load %arg2[%c0_1, %c0_2] : memref<128x128xf32, #tpu.memory_space<vmem>>, vector<128x128xf32>
    %cst = arith.constant dense<0.000000e+00> : vector<16x128xf32>
    %2 = tpu.matmul %0, %1, %cst {dimension_numbers = #tpu.dot_dimension_numbers<[1], [0], [0], [1], [0, 0, 1, 1], [], []>} : vector<16x128xf32>, vector<128x128xf32>, vector<16x128xf32> -> vector<16x128xf32>
    %c0_3 = arith.constant 0 : index
    %c0_4 = arith.constant 0 : index
    %3 = vector.load %arg3[%c0_3, %c0_4] : memref<1x128xf32, #tpu.memory_space<vmem>>, vector<1x128xf32>
    %4 = vector.broadcast %3 : vector<1x128xf32> to vector<16x128xf32>
    %5 = arith.addf %2, %4 : vector<16x128xf32>
    %c0_5 = arith.constant 0 : index
    %c0_6 = arith.constant 0 : index
    %6 = vector.load %arg8[%c0_5, %c0_6] : memref<16x128xf32, #tpu.memory_space<vmem>>, vector<16x128xf32>
    tpu.vector_store %arg8[%c0_5, %c0_6], %5 {strides = array<i32>} : memref<16x128xf32, #tpu.memory_space<vmem>>, vector<16x128xf32>,
    %c0_7 = arith.constant 0 : index
    %c0_8 = arith.constant 0 : index
    %7 = vector.load %arg4[%c0_7, %c0_8] : memref<128x128xf32, #tpu.memory_space<vmem>>, vector<128x128xf32>
    %cst_9 = arith.constant dense<0.000000e+00> : vector<16x128xf32>
    %8 = tpu.matmul %0, %7, %cst_9 {dimension_numbers = #tpu.dot_dimension_numbers<[1], [0], [0], [1], [0, 0, 1, 1], [], []>} : vector<16x128xf32>, vector<128x128xf32>, vector<16x128xf32> -> vector<16x128xf32>
    %c0_10 = arith.constant 0 : index
    %c0_11 = arith.constant 0 : index
    %9 = vector.load %arg5[%c0_10, %c0_11] : memref<1x128xf32, #tpu.memory_space<vmem>>, vector<1x128xf32>
    %10 = vector.broadcast %9 : vector<1x128xf32> to vector<16x128xf32>
    %11 = arith.addf %8, %10 : vector<16x128xf32>
    %c0_12 = arith.constant 0 : index
    %c0_13 = arith.constant 0 : index
    %12 = vector.load %arg9[%c0_12, %c0_13] : memref<16x128xf32, #tpu.memory_space<vmem>>, vector<16x128xf32>
    tpu.vector_store %arg9[%c0_12, %c0_13], %11 {strides = array<i32>} : memref<16x128xf32, #tpu.memory_space<vmem>>, vector<16x128xf32>,
    %c0_14 = arith.constant 0 : index
    %c0_15 = arith.constant 0 : index
    %13 = vector.load %arg6[%c0_14, %c0_15] : memref<128x128xf32, #tpu.memory_space<vmem>>, vector<128x128xf32>
    %cst_16 = arith.constant dense<0.000000e+00> : vector<16x128xf32>
    %14 = tpu.matmul %0, %13, %cst_16 {dimension_numbers = #tpu.dot_dimension_numbers<[1], [0], [0], [1], [0, 0, 1, 1], [], []>} : vector<16x128xf32>, vector<128x128xf32>, vector<16x128xf32> -> vector<16x128xf32>
    %c0_17 = arith.constant 0 : index
    %c0_18 = arith.constant 0 : index
    %15 = vector.load %arg7[%c0_17, %c0_18] : memref<1x128xf32, #tpu.memory_space<vmem>>, vector<1x128xf32>
    %16 = vector.broadcast %15 : vector<1x128xf32> to vector<16x128xf32>
    %17 = arith.addf %14, %16 : vector<16x128xf32>
    %c0_19 = arith.constant 0 : index
    %c0_20 = arith.constant 0 : index
    %18 = vector.load %arg10[%c0_19, %c0_20] : memref<16x128xf32, #tpu.memory_space<vmem>>, vector<16x128xf32>
    tpu.vector_store %arg10[%c0_19, %c0_20], %17 {strides = array<i32>} : memref<16x128xf32, #tpu.memory_space<vmem>>, vector<16x128xf32>,
    return
  }
  func.func @transform_0(%arg0: i32) -> (i32, i32) {
    %c0_i32 = arith.constant 0 : i32
    %c0_i32_0 = arith.constant 0 : i32
    return %arg0, %c0_i32 : i32, i32
  }
  func.func @transform_1(%arg0: i32) -> (i32, i32) {
    %c0_i32 = arith.constant 0 : i32
    %c0_i32_0 = arith.constant 0 : i32
    %c0_i32_1 = arith.constant 0 : i32
    return %c0_i32, %c0_i32_0 : i32, i32
  }
  func.func @transform_2(%arg0: i32) -> (i32, i32) {
    %c0_i32 = arith.constant 0 : i32
    %c0_i32_0 = arith.constant 0 : i32
    %c0_i32_1 = arith.constant 0 : i32
    return %c0_i32, %c0_i32_0 : i32, i32
  }
  func.func @transform_3(%arg0: i32) -> (i32, i32) {
    %c0_i32 = arith.constant 0 : i32
    %c0_i32_0 = arith.constant 0 : i32
    %c0_i32_1 = arith.constant 0 : i32
    return %c0_i32, %c0_i32_0 : i32, i32
  }
  func.func @transform_4(%arg0: i32) -> (i32, i32) {
    %c0_i32 = arith.constant 0 : i32
    %c0_i32_0 = arith.constant 0 : i32
    %c0_i32_1 = arith.constant 0 : i32
    return %c0_i32, %c0_i32_0 : i32, i32
  }
  func.func @transform_5(%arg0: i32) -> (i32, i32) {
    %c0_i32 = arith.constant 0 : i32
    %c0_i32_0 = arith.constant 0 : i32
    %c0_i32_1 = arith.constant 0 : i32
    return %c0_i32, %c0_i32_0 : i32, i32
  }
  func.func @transform_6(%arg0: i32) -> (i32, i32) {
    %c0_i32 = arith.constant 0 : i32
    %c0_i32_0 = arith.constant 0 : i32
    %c0_i32_1 = arith.constant 0 : i32
    return %c0_i32, %c0_i32_0 : i32, i32
  }
  func.func @transform_7(%arg0: i32) -> (i32, i32) {
    %c0_i32 = arith.constant 0 : i32
    %c0_i32_0 = arith.constant 0 : i32
    return %arg0, %c0_i32 : i32, i32
  }
  func.func @transform_8(%arg0: i32) -> (i32, i32) {
    %c0_i32 = arith.constant 0 : i32
    %c0_i32_0 = arith.constant 0 : i32
    return %arg0, %c0_i32 : i32, i32
  }
  func.func @transform_9(%arg0: i32) -> (i32, i32) {
    %c0_i32 = arith.constant 0 : i32
    %c0_i32_0 = arith.constant 0 : i32
    return %arg0, %c0_i32 : i32, i32
  }
}

</mosaic_0001>

<bundles_post_ra>
// kernel: tpu_custom_call.1
= control target key start
LH: loop header
LB: loop body
LE: loop exit
PB: predicated region body
PF: predicated region fallthrough
CT: control target
= control target key end

     0   :  { %15 = vsyncpa [#allocation3], 0  ;;  %s603_s0 = inlined_call_operand.hbm [shape: f32[16,128], index: 0, kind: input, shape index: {}]   ;;  %s604_s1 = inlined_call_operand.hbm [shape: f32[128,128], index: 1, kind: input, shape index: {}]   ;;  %s605_s2 = inlined_call_operand.vmem [shape: f32[1,128], index: 2, kind: input, shape index: {}]   ;;  %s606_s3 = inlined_call_operand.hbm [shape: f32[128,128], index: 3, kind: input, shape index: {}]   ;;  %s607_s4 = inlined_call_operand.vmem [shape: f32[1,128], index: 4, kind: input, shape index: {}]   ;;  %s608_s5 = inlined_call_operand.hbm [shape: f32[128,128], index: 5, kind: input, shape index: {}]   ;;  %s609_s6 = inlined_call_operand.vmem [shape: f32[1,128], index: 6, kind: input, shape index: {}]   ;;  %s610_s7 = inlined_call_operand.hbm [shape: f32[16,128], index: 7, kind: output, shape index: {0}]   ;;  %s611_s8 = inlined_call_operand.hbm [shape: f32[16,128], index: 8, kind: output, shape index: {1}]   ;;  %s612_s9 = inlined_call_operand.hbm [shape: f32[16,128], index: 9, kind: output, shape index: {2}]  }
   0x1   :  { %16 = vsyncpa [#allocation6], 0 }
   0x2   :  { %17 = vsyncpa [#allocation9], 0 }
   0x3   :  { %18 = vsyncpa [#allocation4], 0 }
   0x4   :  { %19 = vsyncpa [#allocation12], 0  ;;  %s37_s11 = sshll.u32 %s604_s1, 4  ;;  %s493_s12 = smov [#allocation5]   ;;  %s38_s11 = int_to_ptr.hbm [resolvable:$true] %s37_s11 }
   0x5   :  { %s39_s13 = sshll.u32 %s493_s12, 4  ;;  %s24_s16 = sshll.u32 %s603_s0, 4  ;;  %s40_s13 = int_to_ptr.vmem [resolvable:$true] %s39_s13  ;;  %s25_s16 = int_to_ptr.hbm [resolvable:$true] %s24_s16 }
   0x6   :  { %s494_s17 = smov 128   ;;  %s495_s18 = smov 8  }
   0x7   :  { %45 = dma.hbm_to_vmem [thread:$0]  %s38_s11, 2048, %s40_s13, [#allocation6], %s494_s17, %s494_s17, %s495_s18  }
   0x8   :  { %s496_s19 = smov [#allocation2]   ;;  %s52_s1 = sshll.u32 %s606_s3, 4  ;;  %s53_s1 = int_to_ptr.hbm [resolvable:$true] %s52_s1 }
   0x9   :  { %s26_s20 = sshll.u32 %s496_s19, 4  ;;  %s67_s24 = sshll.u32 %s608_s5, 4  ;;  %s27_s20 = int_to_ptr.vmem [resolvable:$true] %s26_s20  ;;  %s68_s24 = int_to_ptr.hbm [resolvable:$true] %s67_s24 }
   0xa   :  { %32 = dma.hbm_to_vmem [thread:$0]  %s25_s16, 256, %s27_s20, [#allocation3], %s494_s17, %s494_s17, %s495_s18  }
   0xb   :  { %s497_s25 = smov [#allocation7]   ;;  %s498_s27 = smov [#allocation8]  }
   0xc   :  { %s54_s26 = sshll.u32 %s497_s25, 4  ;;  %s69_s3 = sshll.u32 %s498_s27, 4  ;;  %s55_s26 = int_to_ptr.vmem [resolvable:$true] %s54_s26  ;;  %s70_s3 = int_to_ptr.vmem [resolvable:$true] %s69_s3 }
   0xd   :  { %60 = dma.hbm_to_vmem [thread:$0]  %s53_s1, 2048, %s55_s26, [#allocation6], %s494_s17, %s494_s17, %s495_s18  }
   0xe   :  { %75 = dma.hbm_to_vmem [thread:$0]  %s68_s24, 2048, %s70_s3, [#allocation9], %s494_s17, %s494_s17, %s495_s18  }
   0xf   :  { %483 = dma.done.wait [#allocation3], 256  }
  0x10   :  { %484 = vsyncadd [#allocation3], 4294967040 }
  0x11   :  { %485 = dma.done.wait [#allocation6], 4096  }
  0x12   :  { %486 = vsyncadd [#allocation6], 4294963200 }
  0x13   :  { %487 = dma.done.wait [#allocation9], 2048  }
  0x14   :  { %488 = vsyncadd [#allocation9], 4294965248  ;;  %v201_v0 = vld [vmem:[#allocation8 + $0x78] sm:$0xff]  ;;  %v200_v1 = vld [vmem:[#allocation8 + $0x70] sm:$0xff]  ;;  %s499_s12 = smov [#allocation10]   ;;  %s500_s16 = smov [#allocation11]  }
  0x15   :  { %206 = vmatpush.msra.mxu2 %v201_v0  ;;  %v156_v2 = vld [vmem:[#allocation7 + $0x78] sm:$0xff]  ;;  %v155_v3 = vld [vmem:[#allocation7 + $0x70] sm:$0xff]  ;;  %v199_v4 = vld [vmem:[#allocation8 + $0x68] sm:$0xff]  ;;  %s235_s13 = sshll.u32 %s499_s12, 4  ;;  %s248_s19 = sshll.u32 %s500_s16, 4  ;;  %s236_s13 = int_to_ptr.vmem [resolvable:$true] %s235_s13  ;;  %s249_s19 = int_to_ptr.vmem [resolvable:$true] %s248_s19 }
  0x16   :  { %161 = vmatpush.msra.mxu1 %v156_v2  ;;  %v111_v5 = vld [vmem:[#allocation5 + $0x78] sm:$0xff]  ;;  %v154_v6 = vld [vmem:[#allocation7 + $0x68] sm:$0xff]  ;;  %v110_v7 = vld [vmem:[#allocation5 + $0x70] sm:$0xff]  ;;  %s263_s0 = sshll.u32 %s612_s9, 4  ;;  %s264_s0 = int_to_ptr.hbm [resolvable:$true] %s263_s0 }
  0x17   :  { %207 = vmatpush.msra.mxu2 %v200_v1  ;;  %287 = vmatpush.msra.mxu3 %v111_v5  ;;  %v198_v8 = vld [vmem:[#allocation8 + $0x60] sm:$0xff]  ;;  %v109_v9 = vld [vmem:[#allocation5 + $0x68] sm:$0xff]  ;;  %v197_v11 = vld [vmem:[#allocation8 + $0x58] sm:$0xff] }
  0x18   :  { %162 = vmatpush.msra.mxu1 %v155_v3  ;;  %116 = vmatpush.msra.mxu0 %v111_v5  ;;  %v153_v10 = vld [vmem:[#allocation7 + $0x60] sm:$0xff]  ;;  %v152_v13 = vld [vmem:[#allocation7 + $0x58] sm:$0xff]  ;;  %v196_v14 = vld [vmem:[#allocation8 + $0x50] sm:$0xff] }
  0x19   :  { %208 = vmatpush.msra.mxu2 %v199_v4  ;;  %288 = vmatpush.msra.mxu3 %v110_v7  ;;  %v108_v12 = vld [vmem:[#allocation5 + $0x60] sm:$0xff]  ;;  %v107_v15 = vld [vmem:[#allocation5 + $0x58] sm:$0xff]  ;;  %v151_v16 = vld [vmem:[#allocation7 + $0x50] sm:$0xff] }
  0x1a   :  { %163 = vmatpush.msra.mxu1 %v154_v6  ;;  %117 = vmatpush.msra.mxu0 %v110_v7  ;;  %v195_v17 = vld [vmem:[#allocation8 + $0x48] sm:$0xff]  ;;  %v106_v18 = vld [vmem:[#allocation5 + $0x50] sm:$0xff]  ;;  %v194_v20 = vld [vmem:[#allocation8 + $0x40] sm:$0xff] }
  0x1b   :  { %209 = vmatpush.msra.mxu2 %v198_v8  ;;  %289 = vmatpush.msra.mxu3 %v109_v9  ;;  %v150_v19 = vld [vmem:[#allocation7 + $0x48] sm:$0xff]  ;;  %v149_v22 = vld [vmem:[#allocation7 + $0x40] sm:$0xff]  ;;  %v193_v23 = vld [vmem:[#allocation8 + $0x38] sm:$0xff] }
  0x1c   :  { %164 = vmatpush.msra.mxu1 %v153_v10  ;;  %118 = vmatpush.msra.mxu0 %v109_v9  ;;  %v105_v21 = vld [vmem:[#allocation5 + $0x48] sm:$0xff]  ;;  %v104_v24 = vld [vmem:[#allocation5 + $0x40] sm:$0xff]  ;;  %v148_v25 = vld [vmem:[#allocation7 + $0x38] sm:$0xff] }
  0x1d   :  { %210 = vmatpush.msra.mxu2 %v197_v11  ;;  %290 = vmatpush.msra.mxu3 %v108_v12  ;;  %v192_v26 = vld [vmem:[#allocation8 + $0x30] sm:$0xff]  ;;  %v103_v27 = vld [vmem:[#allocation5 + $0x38] sm:$0xff]  ;;  %v191_v29 = vld [vmem:[#allocation8 + $0x28] sm:$0xff] }
  0x1e   :  { %165 = vmatpush.msra.mxu1 %v152_v13  ;;  %119 = vmatpush.msra.mxu0 %v108_v12  ;;  %v147_v28 = vld [vmem:[#allocation7 + $0x30] sm:$0xff]  ;;  %v146_v31 = vld [vmem:[#allocation7 + $0x28] sm:$0xff]  ;;  %v190_v32 = vld [vmem:[#allocation8 + $0x20] sm:$0xff] }
  0x1f   :  { %211 = vmatpush.msra.mxu2 %v196_v14  ;;  %291 = vmatpush.msra.mxu3 %v107_v15  ;;  %v102_v30 = vld [vmem:[#allocation5 + $0x30] sm:$0xff]  ;;  %v101_v33 = vld [vmem:[#allocation5 + $0x28] sm:$0xff]  ;;  %v145_v34 = vld [vmem:[#allocation7 + $0x20] sm:$0xff] }
  0x20   :  { %166 = vmatpush.msra.mxu1 %v151_v16  ;;  %120 = vmatpush.msra.mxu0 %v107_v15  ;;  %v189_v35 = vld [vmem:[#allocation8 + $0x18] sm:$0xff]  ;;  %v100_v36 = vld [vmem:[#allocation5 + $0x20] sm:$0xff]  ;;  %v188_v38 = vld [vmem:[#allocation8 + $0x10] sm:$0xff] }
  0x21   :  { %212 = vmatpush.msra.mxu2 %v195_v17  ;;  %292 = vmatpush.msra.mxu3 %v106_v18  ;;  %v144_v37 = vld [vmem:[#allocation7 + $0x18] sm:$0xff]  ;;  %v143_v40 = vld [vmem:[#allocation7 + $0x10] sm:$0xff]  ;;  %v187_v41 = vld [vmem:[#allocation8 + $0x8] sm:$0xff] }
  0x22   :  { %167 = vmatpush.msra.mxu1 %v150_v19  ;;  %121 = vmatpush.msra.mxu0 %v106_v18  ;;  %v99_v39 = vld [vmem:[#allocation5 + $0x18] sm:$0xff]  ;;  %v98_v42 = vld [vmem:[#allocation5 + $0x10] sm:$0xff]  ;;  %v142_v43 = vld [vmem:[#allocation7 + $0x8] sm:$0xff] }
  0x23   :  { %213 = vmatpush.msra.mxu2 %v194_v20  ;;  %293 = vmatpush.msra.mxu3 %v105_v21  ;;  %v186_v44 = vld [vmem:[#allocation8] sm:$0xff]  ;;  %v97_v45 = vld [vmem:[#allocation5 + $0x8] sm:$0xff]  ;;  %v94_v46 = vld [vmem:[#allocation2] sm:$0xff] }
  0x24   :  { %168 = vmatpush.msra.mxu1 %v149_v22  ;;  %122 = vmatpush.msra.mxu0 %v105_v21  ;;  %v141_v47 = vld [vmem:[#allocation7] sm:$0xff]  ;;  %v95_v49 = vld [vmem:[#allocation2 + $0x8] sm:$0xff]  ;;  %v312_v50 = vld [vmem:[%s607_s4] ss:$0 sm:$0xff]  ;;  %s237_s4 = sshll.u32 %s610_s7, 4  ;;  %s238_s4 = int_to_ptr.hbm [resolvable:$true] %s237_s4 }
  0x25   :  { %214 = vmatpush.msra.mxu2 %v193_v23  ;;  %294 = vmatpush.msra.mxu3 %v104_v24  ;;  %v96_v48 = vld [vmem:[#allocation5] sm:$0xff]  ;;  %v314_v53 = vld [vmem:[%s605_s2] ss:$0 sm:$0xff]  ;;  %s250_s2 = sshll.u32 %s611_s8, 4  ;;  %s251_s2 = int_to_ptr.hbm [resolvable:$true] %s250_s2 }
  0x26   :  { %169 = vmatpush.msra.mxu1 %v148_v25  ;;  %123 = vmatpush.msra.mxu0 %v104_v24  ;;  %v313_v54 = vld [vmem:[%s609_s6] ss:$0 sm:$0xff]  ;;  %s501_s6 = smov [#allocation13]  }
  0x27   :  { %215 = vmatpush.msra.mxu2 %v192_v26  ;;  %295 = vmatpush.msra.mxu3 %v103_v27  ;;  %s261_s7 = sshll.u32 %s501_s6, 4  ;;  %s262_s7 = int_to_ptr.vmem [resolvable:$true] %s261_s7 }
  0x28   :  { %170 = vmatpush.msra.mxu1 %v147_v28  ;;  %124 = vmatpush.msra.mxu0 %v103_v27 }
  0x29   :  { %216 = vmatpush.msra.mxu2 %v191_v29  ;;  %296 = vmatpush.msra.mxu3 %v102_v30 }
  0x2a   :  { %171 = vmatpush.msra.mxu1 %v146_v31  ;;  %125 = vmatpush.msra.mxu0 %v102_v30 }
  0x2b   :  { %217 = vmatpush.msra.mxu2 %v190_v32  ;;  %297 = vmatpush.msra.mxu3 %v101_v33 }
  0x2c   :  { %172 = vmatpush.msra.mxu1 %v145_v34  ;;  %126 = vmatpush.msra.mxu0 %v101_v33 }
  0x2d   :  { %218 = vmatpush.msra.mxu2 %v189_v35  ;;  %298 = vmatpush.msra.mxu3 %v100_v36 }
  0x2e   :  { %173 = vmatpush.msra.mxu1 %v144_v37  ;;  %127 = vmatpush.msra.mxu0 %v100_v36 }
  0x2f   :  { %219 = vmatpush.msra.mxu2 %v188_v38  ;;  %299 = vmatpush.msra.mxu3 %v99_v39 }
  0x30   :  { %174 = vmatpush.msra.mxu1 %v143_v40  ;;  %128 = vmatpush.msra.mxu0 %v99_v39 }
  0x31   :  { %220 = vmatpush.msra.mxu2 %v187_v41  ;;  %300 = vmatpush.msra.mxu3 %v98_v42 }
  0x32   :  { %175 = vmatpush.msra.mxu1 %v142_v43  ;;  %129 = vmatpush.msra.mxu0 %v98_v42 }
  0x33   :  { %221 = vmatpush.msra.mxu2 %v186_v44  ;;  %301 = vmatpush.msra.mxu3 %v97_v45 }
  0x34   :  { %222 = vmatmul.f32.vlgmr.msra.gmra.mxu2 %v94_v46  ;;  %176 = vmatpush.msra.mxu1 %v141_v47 }
  0x35   :  { %177 = vmatmul.f32.vlgmr.msra.gmra.mxu1 %v94_v46  ;;  %302 = vmatpush.msra.mxu3 %v96_v48 }
  0x36   :  { %135 = vmatmul.f32.vlgmr.msra.gmra.mxu3 %v95_v49  ;;  %130 = vmatpush.msra.mxu0 %v97_v45 }
  0x38   :  { %131 = vmatpush.msra.mxu0 %v96_v48 }
  0x39   :  { %132 = vmatmul.f32.vlgmr.msra.gmra.mxu0 %v94_v46 }
  0x3c   :  { %225 = vmatmul.f32.gmra.mxu2 %v95_v49 }
  0x3d   :  { %180 = vmatmul.f32.gmra.mxu1 %v95_v49 }
  0xb2   :  { %v178_v51 = vpop.f32.mrf.mxu1 }
  0xb3   :  { %v179_v52 = vadd.f32 %v312_v50, %v178_v51 }
  0xb5   :  { %184 = vst [vmem:[#allocation11] sm:$0xff] %v179_v52 }
  0xb6   :  { %v133_v55 = vpop.f32.mrf.mxu0 }
  0xb7   :  { %v223_v56 = vpop.f32.mrf.mxu2  ;;  %v134_v57 = vadd.f32 %v314_v53, %v133_v55 }
  0xb8   :  { %v224_v58 = vadd.f32 %v313_v54, %v223_v56 }
  0xb9   :  { %139 = vst [vmem:[#allocation10] sm:$0xff] %v134_v57  ;;  %v136_v59 = vpop.f32.mrf.mxu3 }
  0xba   :  { %229 = vst [vmem:[#allocation13] sm:$0xff] %v224_v58  ;;  %v181_v60 = vpop.f32.mrf.mxu1  ;;  %v137_v61 = vadd.f32 %v314_v53, %v136_v59 }
  0xbb   :  { %v182_v62 = vadd.f32 %v312_v50, %v181_v60 }
  0xbc   :  { %140 = vst [vmem:[#allocation10 + $0x8] sm:$0xff] %v137_v61 }
  0xbd   :  { %185 = vst [vmem:[#allocation11 + $0x8] sm:$0xff] %v182_v62  ;;  %243 = dma.vmem_to_hbm [thread:$0]  %s236_s13, 256, %s238_s4, [#allocation4], %s494_s17, %s494_s17, %s495_s18  }
  0xbe   :  { %256 = dma.vmem_to_hbm [thread:$0]  %s249_s19, 256, %s251_s2, [#allocation12], %s494_s17, %s494_s17, %s495_s18  }
  0xbf   :  { %v226_v63 = vpop.f32.mrf.mxu2 }
  0xc0   :  { %v227_v0 = vadd.f32 %v313_v54, %v226_v63 }
  0xc2   :  { %230 = vst [vmem:[#allocation13 + $0x8] sm:$0xff] %v227_v0 }
  0xc3   :  { %269 = dma.vmem_to_hbm [thread:$0]  %s262_s7, 256, %s264_s0, [#allocation12], %s494_s17, %s494_s17, %s495_s18  }
  0xc4   :  { %489 = dma.done.wait [#allocation4], 256  }
  0xc5   :  { %490 = vsyncadd [#allocation4], 4294967040 }
  0xc6   :  { %491 = dma.done.wait [#allocation12], 512  }
  0xc7   :  { %492 = vsyncadd [#allocation12], 4294966784 }
  0xc8   :  { %282 = vsyncpa [#allocation3], 1 }
  0xc9   :  { %283 = vsyncpa [#allocation6], 1 }
  0xca   :  { %284 = vsyncpa [#allocation9], 1 }
  0xcb   :  { %285 = vsyncpa [#allocation4], 1 }
  0xcc   :  { %286 = vsyncpa [#allocation12], 1 }

</bundles_post_ra>
